<compile_context>
chip_gen: v5e
topology: v5e:2x2
jax: 0.10.0
libtpu: 0.0.40
codegen_flags: <defaults>
</compile_context>

<pallas_src>
import functools

import jax
import jax.numpy as jnp
from jax.experimental import pallas as pl
from jax.experimental.pallas import tpu as pltpu


# -----------------------------------------------------------------------------
# Fused kernel: (per batch element, per Cout tile)
#   for each phase g:  S_g = patches_g @ W_g   (bf16 operands, f32 accumulate)
#   InstanceNorm over (all phases, all spatial)  +  LeakyReLU(0.2)
# -----------------------------------------------------------------------------
def _fused_conv_in_lrelu_kernel(p_ref, w_ref, o_ref, *, eps, slope):
    # p_ref: (1, G, P, K)   bf16 im2col patches (G=1 for conv, G=4 phases for conv-transpose)
    # w_ref: (G, K, CT)     bf16 weight matrices (CT = Cout tile)
    # o_ref: (1, G, P, CT)  output (f32)
    G = p_ref.shape[1]
    P = p_ref.shape[2]

    svals = []
    for g in range(G):
        svals.append(
            jnp.dot(p_ref[0, g], w_ref[g], preferred_element_type=jnp.float32)
        )  # (P, CT) f32

    inv_count = 1.0 / float(G * P)
    mean = sum(jnp.sum(s, axis=0, keepdims=True) for s in svals) * inv_count      # (1, CT)
    var = sum(jnp.sum((s - mean) ** 2, axis=0, keepdims=True) for s in svals) * inv_count
    inv_std = jax.lax.rsqrt(var + eps)

    for g in range(G):
        y = (svals[g] - mean) * inv_std
        y = jnp.where(y >= 0, y, slope * y)
        o_ref[0, g] = y.astype(o_ref.dtype)


# -----------------------------------------------------------------------------
# Wrapper-side layout plumbing (im2col, weight matrices, pixel shuffle)
# -----------------------------------------------------------------------------
def _im2col_down(x_nhwc):
    """k=4, s=2, p=1 conv patches: (N, 1, Ho*Wo, 16*Cin)."""
    N, H, W, C = x_nhwc.shape
    Ho = (H - 2) // 2 + 1
    Wo = (W - 2) // 2 + 1
    xp = jnp.pad(x_nhwc, ((0, 0), (1, 1), (1, 1), (0, 0)))
    taps = []
    for dy in range(4):
        for dx in range(4):
            taps.append(xp[:, dy:dy + 2 * Ho:2, dx:dx + 2 * Wo:2, :])
    p = jnp.concatenate(taps, axis=-1).reshape(N, Ho * Wo, 16 * C)
    return p[:, None], Ho, Wo                                  # (N, 1, P, K)


def _conv_weight_matrix(w):
    """PyTorch Conv2d weight (Cout, Cin, 4, 4) -> (1, 16*Cin, Cout)."""
    Cout, Cin = w.shape[0], w.shape[1]
    return jnp.transpose(w, (2, 3, 1, 0)).reshape(16 * Cin, Cout)[None]


def _im2col_up(x_nhwc):
    """Per-parity-phase 2x2 patches for ConvTranspose(k=4,s=2,p=1): (N, 4, H*W, 4*Cin)."""
    N, H, W, C = x_nhwc.shape
    xp = jnp.pad(x_nhwc, ((0, 0), (1, 1), (1, 1), (0, 0)))
    phases = []
    for r in (0, 1):
        for s in (0, 1):
            taps = []
            for dy in (0, 1):
                for dx in (0, 1):
                    taps.append(xp[:, r + dy:r + dy + H, s + dx:s + dx + W, :])
            phases.append(jnp.concatenate(taps, axis=-1).reshape(N, H * W, 4 * C))
    return jnp.stack(phases, axis=1)                            # (N, 4, P, K)


def _convtranspose_phase_weights(w_t):
    """PyTorch ConvTranspose2d weight (Cin, Cout, 4, 4) -> (4, 4*Cin, Cout) per output parity."""
    mats = []
    for r in (0, 1):
        for s in (0, 1):
            blocks = []
            for dy in (0, 1):
                for dx in (0, 1):
                    blocks.append(w_t[:, :, 3 - r - 2 * dy, 3 - s - 2 * dx])   # (Cin, Cout)
            mats.append(jnp.concatenate(blocks, axis=0))        # (4*Cin, Cout)
    return jnp.stack(mats, axis=0)                              # (4, 4*Cin, Cout)


def _pick_cout_tile(cout):
    # Lane-dim blocks must be a multiple of 128 or the full extent.
    if cout % 256 == 0 and cout > 256:
        return 256
    if cout % 128 == 0 and cout > 128:
        return 128
    return cout


# -----------------------------------------------------------------------------
# SamplingBlock forward (NCHW in / NCHW out, matching the PyTorch module)
# -----------------------------------------------------------------------------
def sampling_block_forward(weight, x_nchw, *, down=True):
    x = jnp.transpose(x_nchw, (0, 2, 3, 1))                     # NHWC
    N, H, W, _ = x.shape

    if down:
        patches, Ho, Wo = _im2col_down(x)
        w_mats = _conv_weight_matrix(weight)                    # (1, 16*Cin, Cout)
        Cout = weight.shape[0]
    else:
        patches = _im2col_up(x)
        w_mats = _convtranspose_phase_weights(weight)           # (4, 4*Cin, Cout)
        Cout = weight.shape[1]

    _, G, P, K = patches.shape
    ct = _pick_cout_tile(Cout)

    out = pl.pallas_call(
        functools.partial(_fused_conv_in_lrelu_kernel, eps=1e-5, slope=0.2),
        out_shape=jax.ShapeDtypeStruct((N, G, P, Cout), x.dtype),
        grid=(N, Cout // ct),
        in_specs=[
            pl.BlockSpec((1, G, P, K), lambda n, j: (n, 0, 0, 0)),
            pl.BlockSpec((G, K, ct), lambda n, j: (0, 0, j)),
        ],
        out_specs=pl.BlockSpec((1, G, P, ct), lambda n, j: (n, 0, 0, j)),
        compiler_params=pltpu.CompilerParams(
            dimension_semantics=("parallel", "parallel")),
    )(patches.astype(jnp.bfloat16), w_mats.astype(jnp.bfloat16))

    if down:
        y = out[:, 0].reshape(N, Ho, Wo, Cout)
    else:
        y = out.reshape(N, 2, 2, H, W, Cout)                    # (n, r, s, a, b, co)
        y = jnp.transpose(y, (0, 3, 1, 4, 2, 5)).reshape(N, 2 * H, 2 * W, Cout)

    return jnp.transpose(y, (0, 3, 1, 2))                       # back to NCHW


# -----------------------------------------------------------------------------
# Pure-JAX references (for a loose numerical sanity check vs. PyTorch semantics)
# -----------------------------------------------------------------------------
def _in_lrelu_ref(y):
    mean = jnp.mean(y, axis=(2, 3), keepdims=True)
    var = jnp.mean((y - mean) ** 2, axis=(2, 3), keepdims=True)
    y = (y - mean) * jax.lax.rsqrt(var + 1e-5)
    return jnp.where(y >= 0, y, 0.2 * y)


def _ref_down(weight, x):
    y = jax.lax.conv_general_dilated(
        x, weight, window_strides=(2, 2), padding=((1, 1), (1, 1)),
        dimension_numbers=("NCHW", "OIHW", "NCHW"))
    return _in_lrelu_ref(y)


def _ref_up(weight, x):
    w_flip = weight[:, :, ::-1, ::-1]
    y = jax.lax.conv_general_dilated(
        x, w_flip, window_strides=(1, 1), padding=((2, 2), (2, 2)),
        lhs_dilation=(2, 2),
        dimension_numbers=("NCHW", "IOHW", "NCHW"))
    return _in_lrelu_ref(y)


if __name__ == "__main__":
    key = jax.random.PRNGKey(0)
    kx, kwd, kwu = jax.random.split(key, 3)

    N, Cin, H, W = 2, 4, 16, 16
    x = jax.random.normal(kx, (N, Cin, H, W), jnp.float32)

    fwd = jax.jit(sampling_block_forward, static_argnames=("down",))

    # ---- down=True (default): Conv2d(Cin, 64, k=4, s=2, p=1) + IN + LeakyReLU
    Cout_d = 64
    bound = 1.0 / float(jnp.sqrt(jnp.float32(Cin * 16)))
    w_down = jax.random.uniform(kwd, (Cout_d, Cin, 4, 4), jnp.float32, -bound, bound)

    y_down = fwd(w_down, x, down=True)
    jax.block_until_ready(y_down)
    assert y_down.shape == (N, Cout_d, H // 2, W // 2), y_down.shape
    assert bool(jnp.all(jnp.isfinite(y_down)))
    err_d = float(jnp.max(jnp.abs(y_down - _ref_down(w_down, x))))
    assert err_d < 0.2, err_d                                   # bf16 MXU tolerance

    # ---- down=False: ConvTranspose2d(Cin, 32, k=4, s=2, p=1) + IN + LeakyReLU
    Cout_u = 32
    w_up = jax.random.uniform(kwu, (Cin, Cout_u, 4, 4), jnp.float32, -bound, bound)

    y_up = fwd(w_up, x, down=False)
    jax.block_until_ready(y_up)
    assert y_up.shape == (N, Cout_u, 2 * H, 2 * W), y_up.shape
    assert bool(jnp.all(jnp.isfinite(y_up)))
    err_u = float(jnp.max(jnp.abs(y_up - _ref_up(w_up, x))))
    assert err_u < 0.2, err_u

    print("KERNEL_OK")
</pallas_src>

<mosaic_0001>
module attributes {stable_mosaic.version = 11 : i64} {
  func.func @_fused_conv_in_lrelu_kernel(%arg0: i32, %arg1: i32, %arg2: memref<1x1x64x64xbf16, #tpu.memory_space<vmem>>, %arg3: memref<1x64x64xbf16, #tpu.memory_space<vmem>>, %arg4: memref<1x1x64x64xf32, #tpu.memory_space<vmem>>) attributes {dimension_semantics = [#tpu.dimension_semantics<parallel>, #tpu.dimension_semantics<parallel>], iteration_bounds = array<i64: 2, 1>, scalar_prefetch = 0 : i64, scratch_operands = 0 : i64, tpu.core_type = #tpu.core_type<tc>, window_params = [{transform_indices = @transform_0, window_bounds = array<i64: 1, 1, 64, 64>}, {transform_indices = @transform_1, window_bounds = array<i64: 1, 64, 64>}, {transform_indices = @transform_2, window_bounds = array<i64: 1, 1, 64, 64>}]} {
    %c0 = arith.constant 0 : index
    %c0_0 = arith.constant 0 : index
    %c0_1 = arith.constant 0 : index
    %c0_2 = arith.constant 0 : index
    %0 = vector.load %arg2[%c0, %c0_0, %c0_1, %c0_2] : memref<1x1x64x64xbf16, #tpu.memory_space<vmem>>, vector<1x1x64x64xbf16>
    %1 = vector.shape_cast %0 : vector<1x1x64x64xbf16> to vector<64x64xbf16>
    %c0_3 = arith.constant 0 : index
    %c0_4 = arith.constant 0 : index
    %c0_5 = arith.constant 0 : index
    %2 = vector.load %arg3[%c0_3, %c0_4, %c0_5] : memref<1x64x64xbf16, #tpu.memory_space<vmem>>, vector<1x64x64xbf16>
    %3 = vector.shape_cast %2 : vector<1x64x64xbf16> to vector<64x64xbf16>
    %cst = arith.constant dense<0.000000e+00> : vector<64x64xf32>
    %4 = tpu.matmul %1, %3, %cst {dimension_numbers = #tpu.dot_dimension_numbers<[1], [0], [0], [1], [0, 0, 1, 1], [], []>} : vector<64x64xbf16>, vector<64x64xbf16>, vector<64x64xf32> -> vector<64x64xf32>
    %cst_6 = arith.constant dense<0.000000e+00> : vector<64xf32>
    %5 = vector.multi_reduction <add>, %4, %cst_6 [0] : vector<64x64xf32> to vector<64xf32>
    %6 = vector.shape_cast %5 : vector<64xf32> to vector<1x64xf32>
    %cst_7 = arith.constant 0.000000e+00 : f32
    %7 = vector.broadcast %cst_7 : f32 to vector<1x64xf32>
    %8 = arith.addf %7, %6 : vector<1x64xf32>
    %cst_8 = arith.constant 1.562500e-02 : f32
    %9 = vector.broadcast %cst_8 : f32 to vector<1x64xf32>
    %10 = arith.mulf %8, %9 : vector<1x64xf32>
    %11 = vector.broadcast %10 : vector<1x64xf32> to vector<64x64xf32>
    %12 = arith.subf %4, %11 : vector<64x64xf32>
    %13 = arith.mulf %12, %12 : vector<64x64xf32>
    %cst_9 = arith.constant dense<0.000000e+00> : vector<64xf32>
    %14 = vector.multi_reduction <add>, %13, %cst_9 [0] : vector<64x64xf32> to vector<64xf32>
    %15 = vector.shape_cast %14 : vector<64xf32> to vector<1x64xf32>
    %cst_10 = arith.constant 0.000000e+00 : f32
    %16 = vector.broadcast %cst_10 : f32 to vector<1x64xf32>
    %17 = arith.addf %16, %15 : vector<1x64xf32>
    %cst_11 = arith.constant 1.562500e-02 : f32
    %18 = vector.broadcast %cst_11 : f32 to vector<1x64xf32>
    %19 = arith.mulf %17, %18 : vector<1x64xf32>
    %cst_12 = arith.constant 9.99999974E-6 : f32
    %20 = vector.broadcast %cst_12 : f32 to vector<1x64xf32>
    %21 = arith.addf %19, %20 : vector<1x64xf32>
    %22 = math.rsqrt %21 : vector<1x64xf32>
    %23 = vector.broadcast %10 : vector<1x64xf32> to vector<64x64xf32>
    %24 = arith.subf %4, %23 : vector<64x64xf32>
    %25 = vector.broadcast %22 : vector<1x64xf32> to vector<64x64xf32>
    %26 = arith.mulf %24, %25 : vector<64x64xf32>
    %cst_13 = arith.constant 0.000000e+00 : f32
    %27 = vector.broadcast %cst_13 : f32 to vector<64x64xf32>
    %28 = arith.cmpf oge, %26, %27 : vector<64x64xf32>
    %cst_14 = arith.constant 2.000000e-01 : f32
    %29 = vector.broadcast %cst_14 : f32 to vector<64x64xf32>
    %30 = arith.mulf %29, %26 : vector<64x64xf32>
    %31 = arith.select %28, %26, %30 : vector<64x64xi1>, vector<64x64xf32>
    %c0_15 = arith.constant 0 : index
    %c0_16 = arith.constant 0 : index
    %c0_17 = arith.constant 0 : index
    %c0_18 = arith.constant 0 : index
    %32 = vector.load %arg4[%c0_15, %c0_16, %c0_17, %c0_18] : memref<1x1x64x64xf32, #tpu.memory_space<vmem>>, vector<1x1x64x64xf32>
    %33 = vector.shape_cast %32 : vector<1x1x64x64xf32> to vector<64x64xf32>
    %34 = vector.shape_cast %31 : vector<64x64xf32> to vector<1x1x64x64xf32>
    tpu.vector_store %arg4[%c0_15, %c0_16, %c0_17, %c0_18], %34 {strides = array<i32>} : memref<1x1x64x64xf32, #tpu.memory_space<vmem>>, vector<1x1x64x64xf32>,
    return
  }
  func.func @transform_0(%arg0: i32, %arg1: i32) -> (i32, i32, i32, i32) {
    %c0_i32 = arith.constant 0 : i32
    %c0_i32_0 = arith.constant 0 : i32
    %c0_i32_1 = arith.constant 0 : i32
    %c0_i32_2 = arith.constant 0 : i32
    return %arg0, %c0_i32, %c0_i32_0, %c0_i32_1 : i32, i32, i32, i32
  }
  func.func @transform_1(%arg0: i32, %arg1: i32) -> (i32, i32, i32) {
    %c0_i32 = arith.constant 0 : i32
    %c0_i32_0 = arith.constant 0 : i32
    %c0_i32_1 = arith.constant 0 : i32
    return %c0_i32, %c0_i32_0, %arg1 : i32, i32, i32
  }
  func.func @transform_2(%arg0: i32, %arg1: i32) -> (i32, i32, i32, i32) {
    %c0_i32 = arith.constant 0 : i32
    %c0_i32_0 = arith.constant 0 : i32
    %c0_i32_1 = arith.constant 0 : i32
    return %arg0, %c0_i32, %c0_i32_0, %arg1 : i32, i32, i32, i32
  }
}

</mosaic_0001>

<bundles_post_ra>
// kernel: sampling_block_forward.1
= control target key start
LH: loop header
LB: loop body
LE: loop exit
PB: predicated region body
PF: predicated region fallthrough
CT: control target
= control target key end

     0   :  { %7 = vsyncpa [#allocation3], 0  ;;  %s865_s0 = inlined_call_operand.vmem [shape: bf16[2,1,64,64], index: 0, kind: input, shape index: {}]   ;;  %s866_s1 = inlined_call_operand.vmem [shape: bf16[1,64,64], index: 1, kind: input, shape index: {}]   ;;  %s867_s2 = inlined_call_operand.hbm [shape: f32[2,1,64,64], index: 2, kind: output, shape index: {}]  }
   0x1   :  { %9 = vsyncpa [#allocation3 + $0x1], 0  ;;  %s721_s9 = smov 0   ;;  %s723_s10 = smov 0  }
   0x2   :  { %s725_s11 = smov 0   ;;  %s727_s12 = smov 0  }
   0x3   :  { %s729_s13 = smov 0   ;;  %s731_s14 = smov 0  }
   0x4 LB: > { %s493_s15 = sadd.s32 4294967295, %s702_s14   ;;  %s494_s16 = sadd.s32 4294967294, %s702_s14   ;;  %s702_s14 = sphi %s731_s14, %s15_s14   ;;  %s698_s13 = sphi %s729_s13, %s874_s13   ;;  %s694_s12 = sphi %s727_s12, %s873_s12   ;;  %s690_s11 = sphi %s725_s11, %s872_s11   ;;  %s686_s10 = sphi %s723_s10, %s871_s10   ;;  %s682_s9 = sphi %s721_s9, %s870_s9  }
   0x5   : > { %s27_s17 = sadd.s32 1, %s698_s13  ;;  %s88_s18 = sadd.s32 1, %s690_s11 }
   0x6   : > { %p29_p0 = scmp.ge.s32.totalorder %s27_s17, 2  ;;  %p98_p1 = scmp.ne.s32.totalorder %s690_s11, %s686_s10 }
   0x7   : > { %p99_p2 = scmp.eq.s32.totalorder %s493_s15, 1  ;;  %p104_p3 = scmp.ne.s32.totalorder %s686_s10, %s682_s9 }
   0x8   : > { %s876_s17 = smov (%p29_p0, %s27_s17), 0  ;;  %p105_p5 = scmp.eq.s32.totalorder %s494_s16, 1 }
   0x9   : > { %p761_p4 = por %p99_p2, %p98_p1  ;;  %s83_s20 = ssub.s32 %s698_s13, %s876_s17 }
   0xa   : > { %p498_p6 = scmp.ge.s32.totalorder %s702_s14, 1  ;;  %p86_p7 = scmp.eq.s32.totalorder %s83_s20, 0 }
   0xb   : > { %p768_p8 = por %p105_p5, %p104_p3  ;;  %p138_p9 = scmp.lt.s32.totalorder %s702_s14, 3 }
   0xc   : > { %s774_s22 = scalar_select %p86_p7, %s690_s11, %s88_s18  }
   0xd   : > { %p139_p10 = pnand %p498_p6, %p138_p9 }
   0xe   : > { %p164_p11 = scmp.lt.s32.totalorder (!%p139_p10), %s694_s12, 1  ;;  %s161_s8 = sand.u32 (!%p139_p10), 1, %s686_s10  }
   0xf   : > { %142 = sbr.rel (%p139_p10) target bundleno = 269 (0x10d), region = 28  ;;  %s499_s15 = sshll.u32 (!%p139_p10), %s161_s8, 6 }
  0x10   : > { %s552_s16 = sshll.u32 (!%p139_p10), %s694_s12, 6  ;;  %s390_s26 = scalar_lea.sflag (!%p139_p10), [#allocation3], %s161_s8 }
  0x11   : > { %s402_s23 = scalar_lea.hbm (!%p139_p10), %s867_s2, %s552_s16  ;;  %s644_s3 = scalar_lea.hbm (!%p139_p10), %s867_s2, 128 }
  0x12   : > { %s405_s25 = sshll.u32 (!%p139_p10), %s402_s23, 4  ;;  %s406_s25 = int_to_ptr.hbm [resolvable:$true] %s405_s25 }
  0x14   : > { %v551_v0 = vld [vmem:[%s866_s1 + $0x18] sm:$0xff]  ;;  %v550_v1 = vld [vmem:[%s866_s1 + $0x10] sm:$0xff]  ;;  %s165_s27 = scalar_select %p164_p11, %s694_s12, 1  ;;  %v549_v2 = vld [vmem:[%s866_s1 + $0x8] sm:$0xff]  ;;  %vm234_vm0 = vcmask 523264  }
  0x15   : > { %251 = vmatpush.bf16.msra.mxu0 %v551_v0  ;;  %553 = vmatpush.bf16.msra.mxu1 %v551_v0  ;;  %v548_v3 = vld [vmem:[%s866_s1] sm:$0xff]  ;;  %s163_s12 = scalar_lea.vmem [#allocation2], %s499_s15 }
  0x16   : > { %554 = vmatpush.bf16.msra.mxu2 %v551_v0  ;;  %555 = vmatpush.bf16.msra.mxu3 %v551_v0  ;;  %s543_s30 = sshll.u32 %s165_s27, 5  ;;  %s403_s24 = sshll.u32 %s163_s12, 4  ;;  %s404_s24 = int_to_ptr.vmem [resolvable:$true] %s403_s24 }
  0x17   : > { %s168_s7 = scalar_lea.vmem %s865_s0, %s543_s30  ;;  %s638_s27 = sshra.s32 %s406_s25, 4  ;;  %s639_s27 = int_to_ptr.hbm [resolvable:$true] %s638_s27 }
  0x18   : > { %v544_v4 = vld [vmem:[%s168_s7] sm:$0xff]  ;;  %v545_v5 = vld [vmem:[%s168_s7 + $0x8] sm:$0xff]  ;;  %v546_v6 = vld [vmem:[%s168_s7 + $0x10] sm:$0xff]  ;;  %s640_s28 = scalar_lea.hbm %s639_s27, 64  ;;  %p645_p1 = scmp.lt.s32.totalorder %s639_s27, %s867_s2 }
  0x19   : > { %252 = vmatpush.bf16.msra.mxu0 %v550_v1  ;;  %556 = vmatpush.bf16.msra.mxu1 %v550_v1  ;;  %v547_v7 = vld [vmem:[%s168_s7 + $0x18] sm:$0xff]  ;;  %p641_p12 = scmp.ne.s32.totalorder %s639_s27, %s640_s28  ;;  %p646_p2 = scmp.lt.s32.totalorder %s644_s3, %s640_s28 }
  0x1a   : > { %557 = vmatpush.bf16.msra.mxu2 %v550_v1  ;;  %558 = vmatpush.bf16.msra.mxu3 %v550_v1 }
  0x1b   : > { %p642_p13 = pnand %p641_p12, %p761_p4  ;;  %p647_p3 = por %p646_p2, %p645_p1 }
  0x1d   : > { %253 = vmatpush.bf16.msra.mxu0 %v549_v2  ;;  %559 = vmatpush.bf16.msra.mxu1 %v549_v2  ;;  %p643_p0 = pneg %p642_p13 }
  0x1e   : > { %560 = vmatpush.bf16.msra.mxu2 %v549_v2  ;;  %561 = vmatpush.bf16.msra.mxu3 %v549_v2 }
  0x1f   : > { %p648_p5 = pnand %p647_p3, %p643_p0 }
  0x21   : > { %254 = vmatpush.bf16.msra.mxu0 %v548_v3  ;;  %562 = vmatpush.bf16.msra.mxu1 %v548_v3 }
  0x22   : > { %563 = vmatpush.bf16.msra.mxu2 %v548_v3  ;;  %564 = vmatpush.bf16.msra.mxu3 %v548_v3 }
  0x24   : > { %534 = vmatmul.msk.bf16.vlgmr.msra.gmra.mxu0 %vm234_vm0, %v544_v4  ;;  %535 = vmatmul.msk.bf16.vlgmr.msra.gmra.mxu1 %vm234_vm0, %v545_v5 }
  0x25   : > { %536 = vmatmul.msk.bf16.vlgmr.msra.gmra.mxu2 %vm234_vm0, %v546_v6  ;;  %537 = vmatmul.msk.bf16.vlgmr.msra.gmra.mxu3 %vm234_vm0, %v547_v7 }
  0xa1   : > { %v256_v8 = vpop.f32.mrf.mxu0  ;;  %v261_v9 = vpop.f32.mrf.mxu1 }
  0xa2   : > { %v276_v13 = vsel %vm234_vm0, %v256_v8, 0.0  ;;  %v279_v17 = vsel %vm234_vm0, %v261_v9, 0.0 }
  0xa8   : > { %v266_v10 = vpop.f32.mrf.mxu2  ;;  %v271_v11 = vpop.f32.mrf.mxu3 }
  0xa9   : > { %v258_v12 = vpop.f32.mrf.mxu0  ;;  %v263_v16 = vpop.f32.mrf.mxu1  ;;  %v283_v21 = vsel %vm234_vm0, %v266_v10, 0.0  ;;  %v287_v27 = vsel %vm234_vm0, %v271_v11, 0.0 }
  0xaa   : > { %v277_v14 = vsel %vm234_vm0, %v258_v12, 0.0  ;;  %v281_v19 = vsel %vm234_vm0, %v263_v16, 0.0 }
  0xab   : > { %v278_v15 = vadd.f32 %v277_v14, %v276_v13 }
  0xad   : > { %v280_v18 = vadd.f32 %v279_v17, %v278_v15 }
  0xaf   : > { %v282_v20 = vadd.f32 %v281_v19, %v280_v18 }
  0xb0   : > { %v268_v22 = vpop.f32.mrf.mxu2  ;;  %v273_v26 = vpop.f32.mrf.mxu3 }
  0xb1   : > { %v284_v23 = vadd.f32 %v283_v21, %v282_v20  ;;  %v285_v24 = vsel %vm234_vm0, %v268_v22, 0.0  ;;  %v289_v29 = vsel %vm234_vm0, %v273_v26, 0.0 }
  0xb3   : > { %v286_v25 = vadd.f32 %v285_v24, %v284_v23 }
  0xb5   : > { %v288_v28 = vadd.f32 %v287_v27, %v286_v25 }
  0xb7   : > { %v290_v30 = vadd.f32 %v289_v29, %v288_v28 }
  0xb9   : > { %v291_v31 = vrot.slane %v290_v30, 4 }
  0xbb   : > { %v292_v32 = vadd.f32 %v291_v31, %v290_v30 }
  0xbd   : > { %v293_v33 = vrot.slane %v292_v32, 2 }
  0xbf   : > { %v294_v34 = vadd.f32 %v293_v33, %v292_v32 }
  0xc1   : > { %v295_v35 = vrot.slane %v294_v34, 1 }
  0xc3   : > { %v296_v36 = vadd.f32 %v295_v35, %v294_v34 }
  0xc5   : > { %v298_v37 = vmul.f32 0.015625, %v296_v36 }
  0xc7   : > { %v299_v38 = vsub.f32 %v256_v8, %v298_v37  ;;  %v300_v39 = vsub.f32 %v258_v12, %v298_v37  ;;  %v301_v40 = vsub.f32 %v261_v9, %v298_v37  ;;  %v302_v41 = vsub.f32 %v263_v16, %v298_v37 }
  0xc8   : > { %v303_v42 = vsub.f32 %v266_v10, %v298_v37  ;;  %v304_v46 = vsub.f32 %v268_v22, %v298_v37  ;;  %v305_v51 = vsub.f32 %v271_v11, %v298_v37  ;;  %v306_v55 = vsub.f32 %v273_v26, %v298_v37 }
  0xc9   : > { %v307_v43 = vmul.f32 %v299_v38, %v299_v38  ;;  %v308_v44 = vmul.f32 %v300_v39, %v300_v39  ;;  %v309_v45 = vmul.f32 %v301_v40, %v301_v40  ;;  %v310_v47 = vmul.f32 %v302_v41, %v302_v41 }
  0xca   : > { %v311_v52 = vmul.f32 %v303_v42, %v303_v42  ;;  %v312_v56 = vmul.f32 %v304_v46, %v304_v46  ;;  %v313_v59 = vmul.f32 %v305_v51, %v305_v51  ;;  %v314_v62 = vmul.f32 %v306_v55, %v306_v55 }
  0xcb   : > { %v315_v48 = vsel %vm234_vm0, %v307_v43, 0.0  ;;  %v316_v49 = vsel %vm234_vm0, %v308_v44, 0.0  ;;  %v318_v53 = vsel %vm234_vm0, %v309_v45, 0.0  ;;  %v320_v57 = vsel %vm234_vm0, %v310_v47, 0.0 }
  0xcc   : > { %v317_v50 = vadd.f32 %v316_v49, %v315_v48  ;;  %v322_v60 = vsel %vm234_vm0, %v311_v52, 0.0  ;;  %v324_v63 = vsel %vm234_vm0, %v312_v56, 0.0  ;;  %v326_v1 = vsel %vm234_vm0, %v313_v59, 0.0 }
  0xcd   : > { %v328_v3 = vsel %vm234_vm0, %v314_v62, 0.0 }
  0xce   : > { %v319_v54 = vadd.f32 %v318_v53, %v317_v50 }
  0xd0   : > { %v321_v58 = vadd.f32 %v320_v57, %v319_v54 }
  0xd2   : > { %v323_v61 = vadd.f32 %v322_v60, %v321_v58 }
  0xd4   : > { %v325_v0 = vadd.f32 %v324_v63, %v323_v61 }
  0xd6   : > { %v327_v2 = vadd.f32 %v326_v1, %v325_v0 }
  0xd8   : > { %v329_v4 = vadd.f32 %v328_v3, %v327_v2 }
  0xda   : > { %v330_v5 = vrot.slane %v329_v4, 4 }
  0xdc   : > { %v331_v6 = vadd.f32 %v330_v5, %v329_v4 }
  0xde   : > { %v332_v7 = vrot.slane %v331_v6, 2 }
  0xe0   : > { %v333_v8 = vadd.f32 %v332_v7, %v331_v6 }
  0xe2   : > { %v334_v9 = vrot.slane %v333_v8, 1 }
  0xe4   : > { %v335_v10 = vadd.f32 %v334_v9, %v333_v8 }
  0xe6   : > { %v337_v11 = vmul.f32 0.015625, %v335_v10 }
  0xe8   : > { %v338_v12 = vadd.f32 1e-05, %v337_v11 }
  0xea   : > { %622 = vrsqrt.f32 %v338_v12  ;;  %vm345_vm2 = vweird.f32 %v338_v12 }
  0xf0   : > { %v623_v13 = vpop.eup %622 }
  0xf1   : > { %v340_v14 = vmul.f32 %v623_v13, %v338_v12  ;;  %vm346_vm1 = vweird.f32 %v623_v13 }
  0xf2   : > { %vm347_vm3 = vmor %vm345_vm2, %vm346_vm1 }
  0xf3   : > { %v341_v15 = vmul.f32 %v623_v13, %v340_v14 }
  0xf5   : > { %v342_v16 = vmul.f32 0.5, %v341_v15 }
  0xf7   : > { %v343_v17 = vsub.f32 1.5, %v342_v16 }
  0xf9   : > { %v344_v18 = vmul.f32 %v623_v13, %v343_v17 }
  0xfb   : > { %v348_v19 = vsel %vm347_vm3, %v623_v13, %v344_v18 }
  0xfc   : > { %v349_v20 = vmul.f32 %v348_v19, %v299_v38  ;;  %v350_v21 = vmul.f32 %v348_v19, %v300_v39  ;;  %v351_v22 = vmul.f32 %v348_v19, %v301_v40  ;;  %v352_v23 = vmul.f32 %v348_v19, %v302_v41 }
  0xfd   : > { %v353_v24 = vmul.f32 %v348_v19, %v303_v42  ;;  %v354_v25 = vmul.f32 %v348_v19, %v304_v46  ;;  %v355_v26 = vmul.f32 %v348_v19, %v305_v51  ;;  %v356_v27 = vmul.f32 %v348_v19, %v306_v55 }
  0xfe   : > { %vm357_vm4 = vcmp.ge.f32.partialorder %v349_v20, 0.0  ;;  %vm358_vm5 = vcmp.ge.f32.partialorder %v350_v21, 0.0  ;;  %vm359_vm6 = vcmp.ge.f32.partialorder %v351_v22, 0.0  ;;  %vm360_vm7 = vcmp.ge.f32.partialorder %v352_v23, 0.0 }
  0xff   : > { %vm361_vm8 = vcmp.ge.f32.partialorder %v353_v24, 0.0  ;;  %v365_v28 = vmul.f32 0.2, %v349_v20  ;;  %v366_v29 = vmul.f32 0.2, %v350_v21  ;;  %vm362_vm9 = vcmp.ge.f32.partialorder %v354_v25, 0.0 }
 0x100   : > { %v367_v30 = vmul.f32 0.2, %v351_v22  ;;  %v368_v31 = vmul.f32 0.2, %v352_v23  ;;  %v369_v32 = vmul.f32 0.2, %v353_v24 }
 0x101   : > { %v370_v33 = vmul.f32 0.2, %v354_v25  ;;  %v371_v34 = vmul.f32 0.2, %v355_v26  ;;  %v373_v35 = vsel %vm357_vm4, %v349_v20, %v365_v28  ;;  %v374_v36 = vsel %vm358_vm5, %v350_v21, %v366_v29 }
 0x102   : > { %vm363_vm10 = vcmp.ge.f32.partialorder %v355_v26, 0.0  ;;  %v372_v37 = vmul.f32 0.2, %v356_v27  ;;  %v375_v38 = vsel %vm359_vm6, %v351_v22, %v367_v30  ;;  %v376_v39 = vsel %vm360_vm7, %v352_v23, %v368_v31  ;;  %381 = vst.msk [vmem:[%s163_s12] sm:$0xff] %vm234_vm0, %v373_v35 }
 0x103   : > { %vm364_vm11 = vcmp.ge.f32.partialorder %v356_v27, 0.0  ;;  %v377_v40 = vsel %vm361_vm8, %v353_v24, %v369_v32  ;;  %382 = vst.msk [vmem:[%s163_s12 + $0x8] sm:$0xff] %vm234_vm0, %v374_v36  ;;  %v378_v41 = vsel %vm362_vm9, %v354_v25, %v370_v33  ;;  %v379_v42 = vsel %vm363_vm10, %v355_v26, %v371_v34 }
 0x104   : > { %383 = vst.msk [vmem:[%s163_s12 + $0x10] sm:$0xff] %vm234_vm0, %v375_v38  ;;  %v380_v43 = vsel %vm364_vm11, %v356_v27, %v372_v37 }
 0x105   : > { %384 = vst.msk [vmem:[%s163_s12 + $0x18] sm:$0xff] %vm234_vm0, %v376_v39 }
 0x106   : > { %385 = vst.msk [vmem:[%s163_s12 + $0x20] sm:$0xff] %vm234_vm0, %v377_v40 }
 0x107   : > { %386 = vst.msk [vmem:[%s163_s12 + $0x28] sm:$0xff] %vm234_vm0, %v378_v41 }
 0x108   : > { %387 = vst.msk [vmem:[%s163_s12 + $0x30] sm:$0xff] %vm234_vm0, %v379_v42 }
 0x109   : > { %388 = vst.msk [vmem:[%s163_s12 + $0x38] sm:$0xff] %vm234_vm0, %v380_v43 }
 0x10a   : > { %651 = shalt.err (!%p648_p5)
}
 0x10b   : > { %s704_s6 = smov 128   ;;  %s705_s7 = smov 8  }
 0x10c   : > { %565 = dma.vmem_to_hbm [thread:$0]  (%p761_p4), %s404_s24, 1024, %s406_s25, %s390_s26, %s704_s6, %s704_s6, %s705_s7  }
 0x10d PF: > { %p571_p6 = scmp.ge.s32.totalorder %s702_s14, 2  ;;  %s420_s8 = sand.u32 1, %s682_s9  }
 0x10e   : > { %s421_s15 = scalar_lea.sflag [#allocation3], %s420_s8 }
 0x10f   : > { %p568_p7 = pnand %p571_p6, %p768_p8 }
 0x111   : > { %p569_p9 = pneg %p568_p7 }
 0x113   : > { %677 = dma.done.wait (%p569_p9), %s421_s15, 1024  }
 0x114   : > { %679 = vsyncadd (%p569_p9), %s421_s15, 4294966272  ;;  %s15_s14 = sadd.s32 1, %s702_s14   ;;  %s870_s9 = smov %s686_s10 }
 0x115   : > { %p12_p10 = scmp.ge.s32.totalorder %s15_s14, 4   ;;  %s871_s10 = smov %s690_s11 }
 0x116   : > { %s872_s11 = smov %s774_s22  ;;  %s873_s12 = smov %s698_s13 }
 0x117   : > { %s874_s13 = smov %s876_s17  ;;  %14 = sbr.rel (!%p12_p10) target bundleno = 4 (0x4), region = 66 }
 0x11c   :  { %427 = vsyncpa [#allocation3], 1 }
 0x11d   :  { %429 = vsyncpa [#allocation3 + $0x1], 1 }

</bundles_post_ra>
